<compile_context>
chip_gen: v7x
topology: tpu7x:2x2x1
jax: 0.10.0
libtpu: 0.0.40
codegen_flags: <defaults>
</compile_context>

<pallas_src>
import jax
import jax.numpy as jnp
from jax.experimental import pallas as pl
from jax.experimental.pallas import tpu as pltpu


def _gaussian_kernel(val_ref, mean_ref, inv_std_ref, coef_ref, o_ref):
    # val_ref: (tm, 1) f32 ; mean/inv_std/coef: (1, Kp) f32 ; o_ref: (tm, Kp)
    val = val_ref[...]
    z = (val - mean_ref[...]) * inv_std_ref[...]          # broadcast -> (tm, Kp)
    o_ref[...] = (coef_ref[...] * jnp.exp(-0.5 * z * z)).astype(o_ref.dtype)


def _round_up(a, b):
    return (a + b - 1) // b * b


def gaussian_layer_pallas(x, edge_type, means_w, stds_w, mul_w, bias_w, *, tm=1024):
    """x: [B,N,N] float, edge_type: [B,N,N] int32.

    means_w/stds_w: [1, K] ; mul_w/bias_w: [edge_types, 1].
    Returns [B, N, N, K] in means_w.dtype (matches the PyTorch module).
    """
    B, N1, N2 = x.shape
    K = means_w.shape[-1]
    M = B * N1 * N2
    out_dtype = means_w.dtype

    # --- glue: width-1 embedding gathers + FMA (XLA fuses this tiny op) ---
    mul = mul_w[edge_type][..., 0].astype(x.dtype)        # [B,N,N]
    bias = bias_w[edge_type][..., 0].astype(x.dtype)      # [B,N,N]
    val = (mul * x + bias).astype(jnp.float32).reshape(M, 1)

    # --- precompute per-K constants: hoists both divides out of the kernel ---
    pi = 3.14159
    a = (2.0 * pi) ** 0.5
    std = jnp.abs(stds_w.astype(jnp.float32).reshape(1, K)) + 1e-5
    inv_std = 1.0 / std
    coef = inv_std / a
    mean = means_w.astype(jnp.float32).reshape(1, K)

    # --- pad K to a lane-dense multiple of 128 (unmasked vst on the output) ---
    Kp = _round_up(K, 128)
    if Kp != K:
        mean = jnp.pad(mean, ((0, 0), (0, Kp - K)))
        inv_std = jnp.pad(inv_std, ((0, 0), (0, Kp - K)), constant_values=1.0)
        coef = jnp.pad(coef, ((0, 0), (0, Kp - K)), constant_values=1.0)

    # --- tile sizing: keep double-buffered output tile <= ~8 MiB so it fits
    #     comfortably inside the default scoped VMEM on v5e/v6e/v7x ---
    out_itemsize = jnp.dtype(out_dtype).itemsize
    max_tm = max(8, ((8 * 1024 * 1024) // (2 * Kp * out_itemsize)) // 8 * 8)
    tm = min(tm, max_tm, _round_up(M, 8))

    # --- pad rows to a multiple of tm (arbitrary B, N supported) ---
    Mp = _round_up(M, tm)
    if Mp != M:
        val = jnp.pad(val, ((0, Mp - M), (0, 0)))

    grid = (Mp // tm,)

    out = pl.pallas_call(
        _gaussian_kernel,
        out_shape=jax.ShapeDtypeStruct((Mp, Kp), out_dtype),
        grid_spec=pltpu.PrefetchScalarGridSpec(
            num_scalar_prefetch=0,
            grid=grid,
            in_specs=[
                pl.BlockSpec((tm, 1), lambda i: (i, 0)),    # val = mul*x + bias
                pl.BlockSpec((1, Kp), lambda i: (0, 0)),    # mean
                pl.BlockSpec((1, Kp), lambda i: (0, 0)),    # inv_std
                pl.BlockSpec((1, Kp), lambda i: (0, 0)),    # coef
            ],
            out_specs=pl.BlockSpec((tm, Kp), lambda i: (i, 0)),
        ),
        compiler_params=pltpu.CompilerParams(
            dimension_semantics=("parallel",)),
    )(val, mean, inv_std, coef)

    return out[:M, :K].reshape(B, N1, N2, K)


def _reference(x, edge_type, means_w, stds_w, mul_w, bias_w):
    K = means_w.shape[-1]
    mul = mul_w[edge_type].astype(x.dtype)          # [B,N,N,1]
    bias = bias_w[edge_type].astype(x.dtype)        # [B,N,N,1]
    v = mul * x[..., None] + bias                   # [B,N,N,1]
    v = jnp.broadcast_to(v, v.shape[:-1] + (K,)).astype(jnp.float32)
    mean = means_w.astype(jnp.float32).reshape(-1)
    std = jnp.abs(stds_w.astype(jnp.float32).reshape(-1)) + 1e-5
    pi = 3.14159
    a = (2.0 * pi) ** 0.5
    return (jnp.exp(-0.5 * ((v - mean) / std) ** 2) / (a * std)).astype(means_w.dtype)


if __name__ == "__main__":
    key = jax.random.PRNGKey(0)
    k1, k2, k3, k4, k5, k6 = jax.random.split(key, 6)

    # Module config (small): K=128 gaussian kernels, 16 edge types.
    K = 128
    edge_types = 16
    B, N = 2, 8

    # Parameters (uniform init like the module; mul/bias randomized slightly
    # to exercise the gather + FMA path instead of the trivial 1/0 init).
    means_w = jax.random.uniform(k1, (1, K), jnp.float32, 0.0, 3.0)
    stds_w = jax.random.uniform(k2, (1, K), jnp.float32, 0.0, 3.0)
    mul_w = 1.0 + 0.1 * jax.random.normal(k5, (edge_types, 1), jnp.float32)
    bias_w = 0.1 * jax.random.normal(k6, (edge_types, 1), jnp.float32)

    # Inputs: pairwise distances x [B,N,N], edge types [B,N,N] int.
    x = jax.random.normal(k3, (B, N, N), jnp.float32)
    edge_type = jax.random.randint(k4, (B, N, N), 0, edge_types, jnp.int32)

    out = gaussian_layer_pallas(x, edge_type, means_w, stds_w, mul_w, bias_w)
    out = jax.block_until_ready(out)

    ref = _reference(x, edge_type, means_w, stds_w, mul_w, bias_w)
    assert out.shape == (B, N, N, K)
    assert out.dtype == means_w.dtype
    assert jnp.allclose(out, ref, atol=1e-5, rtol=1e-5)

    print("KERNEL_OK")
</pallas_src>

<mosaic_0001>
module attributes {stable_mosaic.version = 11 : i64} {
  func.func @_gaussian_kernel(%arg0: i32, %arg1: memref<128x1xf32, #tpu.memory_space<vmem>>, %arg2: memref<1x128xf32, #tpu.memory_space<vmem>>, %arg3: memref<1x128xf32, #tpu.memory_space<vmem>>, %arg4: memref<1x128xf32, #tpu.memory_space<vmem>>, %arg5: memref<128x128xf32, #tpu.memory_space<vmem>>) attributes {dimension_semantics = [#tpu.dimension_semantics<parallel>], iteration_bounds = array<i64: 1>, scalar_prefetch = 0 : i64, scratch_operands = 0 : i64, tpu.core_type = #tpu.core_type<tc>, window_params = [{transform_indices = @transform_0, window_bounds = array<i64: 128, 1>}, {pipeline_mode = #tpu.pipeline_mode<synchronous>, transform_indices = @transform_1, window_bounds = array<i64: 1, 128>}, {pipeline_mode = #tpu.pipeline_mode<synchronous>, transform_indices = @transform_2, window_bounds = array<i64: 1, 128>}, {pipeline_mode = #tpu.pipeline_mode<synchronous>, transform_indices = @transform_3, window_bounds = array<i64: 1, 128>}, {transform_indices = @transform_4, window_bounds = array<i64: 128, 128>}]} {
    %c0 = arith.constant 0 : index
    %c0_0 = arith.constant 0 : index
    %0 = vector.load %arg1[%c0, %c0_0] : memref<128x1xf32, #tpu.memory_space<vmem>>, vector<128x1xf32>
    %c0_1 = arith.constant 0 : index
    %c0_2 = arith.constant 0 : index
    %1 = vector.load %arg2[%c0_1, %c0_2] : memref<1x128xf32, #tpu.memory_space<vmem>>, vector<1x128xf32>
    %2 = vector.broadcast %0 : vector<128x1xf32> to vector<128x128xf32>
    %3 = vector.broadcast %1 : vector<1x128xf32> to vector<128x128xf32>
    %4 = arith.subf %2, %3 : vector<128x128xf32>
    %c0_3 = arith.constant 0 : index
    %c0_4 = arith.constant 0 : index
    %5 = vector.load %arg3[%c0_3, %c0_4] : memref<1x128xf32, #tpu.memory_space<vmem>>, vector<1x128xf32>
    %6 = vector.broadcast %5 : vector<1x128xf32> to vector<128x128xf32>
    %7 = arith.mulf %4, %6 : vector<128x128xf32>
    %c0_5 = arith.constant 0 : index
    %c0_6 = arith.constant 0 : index
    %8 = vector.load %arg4[%c0_5, %c0_6] : memref<1x128xf32, #tpu.memory_space<vmem>>, vector<1x128xf32>
    %cst = arith.constant -5.000000e-01 : f32
    %9 = vector.broadcast %cst : f32 to vector<128x128xf32>
    %10 = arith.mulf %9, %7 : vector<128x128xf32>
    %11 = arith.mulf %10, %7 : vector<128x128xf32>
    %12 = math.exp %11 : vector<128x128xf32>
    %13 = vector.broadcast %8 : vector<1x128xf32> to vector<128x128xf32>
    %14 = arith.mulf %13, %12 : vector<128x128xf32>
    %c0_7 = arith.constant 0 : index
    %c0_8 = arith.constant 0 : index
    %15 = vector.load %arg5[%c0_7, %c0_8] : memref<128x128xf32, #tpu.memory_space<vmem>>, vector<128x128xf32>
    tpu.vector_store %arg5[%c0_7, %c0_8], %14 {strides = array<i32>} : memref<128x128xf32, #tpu.memory_space<vmem>>, vector<128x128xf32>,
    return
  }
  func.func @transform_0(%arg0: i32) -> (i32, i32) {
    %c0_i32 = arith.constant 0 : i32
    %c0_i32_0 = arith.constant 0 : i32
    return %arg0, %c0_i32 : i32, i32
  }
  func.func @transform_1(%arg0: i32) -> (i32, i32) {
    %c0_i32 = arith.constant 0 : i32
    %c0_i32_0 = arith.constant 0 : i32
    %c0_i32_1 = arith.constant 0 : i32
    return %c0_i32, %c0_i32_0 : i32, i32
  }
  func.func @transform_2(%arg0: i32) -> (i32, i32) {
    %c0_i32 = arith.constant 0 : i32
    %c0_i32_0 = arith.constant 0 : i32
    %c0_i32_1 = arith.constant 0 : i32
    return %c0_i32, %c0_i32_0 : i32, i32
  }
  func.func @transform_3(%arg0: i32) -> (i32, i32) {
    %c0_i32 = arith.constant 0 : i32
    %c0_i32_0 = arith.constant 0 : i32
    %c0_i32_1 = arith.constant 0 : i32
    return %c0_i32, %c0_i32_0 : i32, i32
  }
  func.func @transform_4(%arg0: i32) -> (i32, i32) {
    %c0_i32 = arith.constant 0 : i32
    %c0_i32_0 = arith.constant 0 : i32
    return %arg0, %c0_i32 : i32, i32
  }
}

</mosaic_0001>

<bundles_post_ra>
// kernel: tpu_custom_call.1
= control target key start
LH: loop header
LB: loop body
LE: loop exit
PB: predicated region body
PF: predicated region fallthrough
CT: control target
= control target key end

     0   :  { %v344_v2 = vmov 0   ;;  %s496_s0 = inlined_call_operand.vmem [shape: f32[128,1], index: 0, kind: input, shape index: {}]   ;;  %s497_s1 = inlined_call_operand.vmem [shape: f32[1,128], index: 1, kind: input, shape index: {}]   ;;  %s498_s2 = inlined_call_operand.vmem [shape: f32[1,128], index: 2, kind: input, shape index: {}]   ;;  %s499_s3 = inlined_call_operand.vmem [shape: f32[1,128], index: 3, kind: input, shape index: {}]   ;;  %s500_s4 = inlined_call_operand.hbm [shape: f32[128,128], index: 4, kind: output, shape index: {}]  }
   0x1   :  { %v20_v0 = vld [vmem:[%s496_s0 + $0x10] sm:$0xff]  ;;  %v18_v1 = vld [vmem:[%s496_s0] sm:$0xff]  ;;  %287 = vset.pattern.permute.xlu1 %v344_v2  ;;  %286 = vset.pattern.permute.xlu0 %v344_v2  ;;  %v21_v3 = vld [vmem:[%s496_s0 + $0x18] sm:$0xff] }
   0x2   :  { %47 = vperm.xlu1 %287, %v20_v0   ;;  %37 = vperm.xlu0 %286, %v18_v1   ;;  %v19_v4 = vld [vmem:[%s496_s0 + $0x8] sm:$0xff] }
   0x6   :  { %52 = vperm.xlu1 %287, %v21_v3   ;;  %42 = vperm.xlu0 %286, %v19_v4  }
   0x7   :  { %9 = vsyncpa [#allocation3], 0  ;;  %v23_v5 = vld [vmem:[%s496_s0 + $0x28] sm:$0xff]  ;;  %v22_v6 = vld [vmem:[%s496_s0 + $0x20] sm:$0xff] }
   0x8   :  { %v25_v7 = vld [vmem:[%s496_s0 + $0x38] sm:$0xff]  ;;  %v24_v8 = vld [vmem:[%s496_s0 + $0x30] sm:$0xff]  ;;  %v27_v9 = vld [vmem:[%s496_s0 + $0x48] sm:$0xff] }
   0x9   :  { %v26_v10 = vld [vmem:[%s496_s0 + $0x40] sm:$0xff]  ;;  %v29_v11 = vld [vmem:[%s496_s0 + $0x58] sm:$0xff]  ;;  %v28_v12 = vld [vmem:[%s496_s0 + $0x50] sm:$0xff] }
   0xa   :  { %62 = vperm.xlu1 %287, %v23_v5   ;;  %57 = vperm.xlu0 %286, %v22_v6   ;;  %v31_v13 = vld [vmem:[%s496_s0 + $0x68] sm:$0xff]  ;;  %v30_v14 = vld [vmem:[%s496_s0 + $0x60] sm:$0xff]  ;;  %v33_v15 = vld [vmem:[%s496_s0 + $0x78] sm:$0xff] }
   0xb   :  { %v32_v16 = vld [vmem:[%s496_s0 + $0x70] sm:$0xff]  ;;  %v424_v17 = vld [vmem:[%s497_s1] ss:$0 sm:$0xff] }
   0xc   :  { %v429_v18 = vld [vmem:[%s498_s2] ss:$0 sm:$0xff]  ;;  %s345_s2 = smov [#allocation2]  }
   0xd   :  { %v452_v3 = vld [vmem:[%s499_s3] ss:$0 sm:$0xff]  ;;  %s268_s3 = sshll.u32 %s345_s2, 4  ;;  %s269_s3 = int_to_ptr.vmem [resolvable:$true] %s268_s3 }
   0xe   :  { %72 = vperm.xlu1 %287, %v25_v7   ;;  %67 = vperm.xlu0 %286, %v24_v8   ;;  %s320_s25 = scalar_lea.vmem %s269_s3, 2048  ;;  %p325_p1 = scmp.lt.s32.totalorder %s269_s3, %s269_s3 }
   0xf   :  { %p321_p0 = scmp.ne.s32.totalorder %s269_s3, %s320_s25  ;;  %p326_p2 = scmp.lt.s32.totalorder %s320_s25, %s320_s25 }
  0x11   :  { %p327_p3 = por %p326_p2, %p325_p1 }
  0x12   :  { %82 = vperm.xlu1 %287, %v27_v9   ;;  %77 = vperm.xlu0 %286, %v26_v10  }
  0x13   :  { %p328_p4 = pnand %p327_p3, %p321_p0 }
  0x16   :  { %92 = vperm.xlu1 %287, %v29_v11   ;;  %87 = vperm.xlu0 %286, %v28_v12  }
  0x1a   :  { %102 = vperm.xlu1 %287, %v31_v13   ;;  %97 = vperm.xlu0 %286, %v30_v14  }
  0x1e   :  { %112 = vperm.xlu1 %287, %v33_v15   ;;  %107 = vperm.xlu0 %286, %v32_v16  }
  0x81   :  { %v48_v19 = vpop.permute.xlu1 %47  ;;  %v38_v20 = vpop.permute.xlu0 %37 }
  0x82   :  { %v123_v21 = vsub.f32 %v48_v19, %v424_v17  ;;  %v121_v22 = vsub.f32 %v38_v20, %v424_v17 }
  0x84   :  { %v146_v23 = vmul.f32 %v429_v18, %v123_v21  ;;  %v144_v24 = vmul.f32 %v429_v18, %v121_v22 }
  0x85   :  { %v53_v25 = vpop.permute.xlu1 %52  ;;  %v43_v26 = vpop.permute.xlu0 %42 }
  0x86   :  { %v163_v27 = vmul.f32 -0.5, %v146_v23  ;;  %v161_v28 = vmul.f32 -0.5, %v144_v24  ;;  %v124_v29 = vsub.f32 %v53_v25, %v424_v17  ;;  %v122_v30 = vsub.f32 %v43_v26, %v424_v17 }
  0x88   :  { %v179_v31 = vmul.f32 %v163_v27, %v146_v23  ;;  %v177_v32 = vmul.f32 %v161_v28, %v144_v24  ;;  %v147_v33 = vmul.f32 %v429_v18, %v124_v29  ;;  %v145_v34 = vmul.f32 %v429_v18, %v122_v30 }
  0x89   :  { %v63_v35 = vpop.permute.xlu1 %62  ;;  %v58_v36 = vpop.permute.xlu0 %57 }
  0x8a   :  { %v197_v37 = vmul.f32 1.442695, %v179_v31  ;;  %v193_v38 = vmul.f32 1.442695, %v177_v32  ;;  %v164_v39 = vmul.f32 -0.5, %v147_v33  ;;  %v162_v40 = vmul.f32 -0.5, %v145_v34 }
  0x8b   :  { %v126_v41 = vsub.f32 %v63_v35, %v424_v17  ;;  %v125_v42 = vsub.f32 %v58_v36, %v424_v17 }
  0x8c   :  { %288 = vpow2.f32 %v197_v37  ;;  %v180_v43 = vmul.f32 %v164_v39, %v147_v33  ;;  %v178_v44 = vmul.f32 %v162_v40, %v145_v34 }
  0x8d   :  { %290 = vpow2.f32 %v193_v38  ;;  %v149_v45 = vmul.f32 %v429_v18, %v126_v41  ;;  %v148_v46 = vmul.f32 %v429_v18, %v125_v42  ;;  %v73_v47 = vpop.permute.xlu1 %72  ;;  %v68_v48 = vpop.permute.xlu0 %67 }
  0x8e   :  { %v199_v49 = vmul.f32 1.442695, %v180_v43  ;;  %v195_v50 = vmul.f32 1.442695, %v178_v44  ;;  %v128_v51 = vsub.f32 %v73_v47, %v424_v17  ;;  %v127_v52 = vsub.f32 %v68_v48, %v424_v17 }
  0x8f   :  { %v166_v53 = vmul.f32 -0.5, %v149_v45  ;;  %v165_v54 = vmul.f32 -0.5, %v148_v46 }
  0x90   :  { %292 = vpow2.f32 %v199_v49  ;;  %v151_v55 = vmul.f32 %v429_v18, %v128_v51  ;;  %v150_v56 = vmul.f32 %v429_v18, %v127_v52 }
  0x91   :  { %294 = vpow2.f32 %v195_v50  ;;  %v182_v57 = vmul.f32 %v166_v53, %v149_v45  ;;  %v181_v58 = vmul.f32 %v165_v54, %v148_v46  ;;  %v83_v59 = vpop.permute.xlu1 %82  ;;  %v78_v60 = vpop.permute.xlu0 %77 }
  0x92   :  { %v168_v61 = vmul.f32 -0.5, %v151_v55  ;;  %v167_v62 = vmul.f32 -0.5, %v150_v56  ;;  %v130_v63 = vsub.f32 %v83_v59, %v424_v17  ;;  %v129_v0 = vsub.f32 %v78_v60, %v424_v17 }
  0x93   :  { %v203_v1 = vmul.f32 1.442695, %v182_v57  ;;  %v201_v2 = vmul.f32 1.442695, %v181_v58 }
  0x94   :  { %v184_v4 = vmul.f32 %v168_v61, %v151_v55  ;;  %v183_v5 = vmul.f32 %v167_v62, %v150_v56  ;;  %v153_v6 = vmul.f32 %v429_v18, %v130_v63  ;;  %v152_v7 = vmul.f32 %v429_v18, %v129_v0 }
  0x95   :  { %296 = vpow2.f32 %v203_v1  ;;  %v93_v8 = vpop.permute.xlu1 %92  ;;  %v88_v9 = vpop.permute.xlu0 %87 }
  0x96   :  { %v289_v10 = vpop.eup %288  ;;  %298 = vpow2.f32 %v201_v2  ;;  %v207_v11 = vmul.f32 1.442695, %v184_v4  ;;  %v205_v12 = vmul.f32 1.442695, %v183_v5  ;;  %v170_v13 = vmul.f32 -0.5, %v153_v6 }
  0x97   :  { %v291_v14 = vpop.eup %290  ;;  %v233_v15 = vmul.f32 %v289_v10, %v452_v3  ;;  %v169_v16 = vmul.f32 -0.5, %v152_v7  ;;  %v132_v19 = vsub.f32 %v93_v8, %v424_v17  ;;  %v131_v20 = vsub.f32 %v88_v9, %v424_v17 }
  0x98   :  { %v231_v21 = vmul.f32 %v291_v14, %v452_v3  ;;  %300 = vpow2.f32 %v207_v11  ;;  %v186_v22 = vmul.f32 %v170_v13, %v153_v6 }
  0x99   :  { %249 = vst [vmem:[#allocation2 + $0x10] sm:$0xff] %v233_v15  ;;  %302 = vpow2.f32 %v205_v12  ;;  %v185_v23 = vmul.f32 %v169_v16, %v152_v7  ;;  %v155_v24 = vmul.f32 %v429_v18, %v132_v19  ;;  %v154_v25 = vmul.f32 %v429_v18, %v131_v20  ;;  %v103_v26 = vpop.permute.xlu1 %102  ;;  %v98_v27 = vpop.permute.xlu0 %97 }
  0x9a   :  { %v293_v28 = vpop.eup %292  ;;  %247 = vst [vmem:[#allocation2] sm:$0xff] %v231_v21  ;;  %v211_v29 = vmul.f32 1.442695, %v186_v22  ;;  %v134_v30 = vsub.f32 %v103_v26, %v424_v17  ;;  %v133_v31 = vsub.f32 %v98_v27, %v424_v17 }
  0x9b   :  { %v295_v32 = vpop.eup %294  ;;  %v234_v33 = vmul.f32 %v293_v28, %v452_v3  ;;  %v209_v34 = vmul.f32 1.442695, %v185_v23  ;;  %v172_v35 = vmul.f32 -0.5, %v155_v24  ;;  %v171_v36 = vmul.f32 -0.5, %v154_v25 }
  0x9c   :  { %v232_v37 = vmul.f32 %v295_v32, %v452_v3  ;;  %304 = vpow2.f32 %v211_v29  ;;  %v157_v38 = vmul.f32 %v429_v18, %v134_v30  ;;  %v156_v39 = vmul.f32 %v429_v18, %v133_v31 }
  0x9d   :  { %250 = vst [vmem:[#allocation2 + $0x18] sm:$0xff] %v234_v33  ;;  %306 = vpow2.f32 %v209_v34  ;;  %v188_v40 = vmul.f32 %v172_v35, %v155_v24  ;;  %v187_v41 = vmul.f32 %v171_v36, %v154_v25  ;;  %v113_v42 = vpop.permute.xlu1 %112  ;;  %v108_v43 = vpop.permute.xlu0 %107 }
  0x9e   :  { %248 = vst [vmem:[#allocation2 + $0x8] sm:$0xff] %v232_v37  ;;  %v174_v44 = vmul.f32 -0.5, %v157_v38  ;;  %v173_v45 = vmul.f32 -0.5, %v156_v39  ;;  %v136_v46 = vsub.f32 %v113_v42, %v424_v17  ;;  %v135_v47 = vsub.f32 %v108_v43, %v424_v17 }
  0x9f   :  { %v297_v48 = vpop.eup %296  ;;  %v215_v49 = vmul.f32 1.442695, %v188_v40  ;;  %v213_v50 = vmul.f32 1.442695, %v187_v41 }
  0xa0   :  { %v299_v51 = vpop.eup %298  ;;  %v236_v52 = vmul.f32 %v297_v48, %v452_v3  ;;  %v190_v53 = vmul.f32 %v174_v44, %v157_v38  ;;  %v189_v54 = vmul.f32 %v173_v45, %v156_v39  ;;  %v159_v55 = vmul.f32 %v429_v18, %v136_v46 }
  0xa1   :  { %v235_v56 = vmul.f32 %v299_v51, %v452_v3  ;;  %308 = vpow2.f32 %v215_v49  ;;  %v158_v57 = vmul.f32 %v429_v18, %v135_v47 }
  0xa2   :  { %v301_v58 = vpop.eup %300  ;;  %252 = vst [vmem:[#allocation2 + $0x28] sm:$0xff] %v236_v52  ;;  %310 = vpow2.f32 %v213_v50  ;;  %v219_v59 = vmul.f32 1.442695, %v190_v53  ;;  %v217_v17 = vmul.f32 1.442695, %v189_v54  ;;  %v176_v60 = vmul.f32 -0.5, %v159_v55 }
  0xa3   :  { %v303_v61 = vpop.eup %302  ;;  %251 = vst [vmem:[#allocation2 + $0x20] sm:$0xff] %v235_v56  ;;  %v238_v62 = vmul.f32 %v301_v58, %v452_v3  ;;  %v175_v63 = vmul.f32 -0.5, %v158_v57 }
  0xa4   :  { %v237_v0 = vmul.f32 %v303_v61, %v452_v3  ;;  %312 = vpow2.f32 %v219_v59  ;;  %v192_v1 = vmul.f32 %v176_v60, %v159_v55 }
  0xa5   :  { %254 = vst [vmem:[#allocation2 + $0x38] sm:$0xff] %v238_v62  ;;  %314 = vpow2.f32 %v217_v17  ;;  %v191_v2 = vmul.f32 %v175_v63, %v158_v57 }
  0xa6   :  { %v305_v4 = vpop.eup %304  ;;  %253 = vst [vmem:[#allocation2 + $0x30] sm:$0xff] %v237_v0  ;;  %v223_v18 = vmul.f32 1.442695, %v192_v1 }
  0xa7   :  { %v307_v5 = vpop.eup %306  ;;  %v240_v6 = vmul.f32 %v305_v4, %v452_v3  ;;  %v221_v7 = vmul.f32 1.442695, %v191_v2 }
  0xa8   :  { %v239_v8 = vmul.f32 %v307_v5, %v452_v3  ;;  %316 = vpow2.f32 %v223_v18 }
  0xa9   :  { %256 = vst [vmem:[#allocation2 + $0x48] sm:$0xff] %v240_v6  ;;  %318 = vpow2.f32 %v221_v7 }
  0xaa   :  { %255 = vst [vmem:[#allocation2 + $0x40] sm:$0xff] %v239_v8 }
  0xab   :  { %v309_v9 = vpop.eup %308 }
  0xac   :  { %v311_v10 = vpop.eup %310  ;;  %v242_v11 = vmul.f32 %v309_v9, %v452_v3 }
  0xad   :  { %v241_v12 = vmul.f32 %v311_v10, %v452_v3 }
  0xae   :  { %v313_v13 = vpop.eup %312  ;;  %258 = vst [vmem:[#allocation2 + $0x58] sm:$0xff] %v242_v11 }
  0xaf   :  { %v315_v14 = vpop.eup %314  ;;  %257 = vst [vmem:[#allocation2 + $0x50] sm:$0xff] %v241_v12  ;;  %v244_v15 = vmul.f32 %v313_v13, %v452_v3 }
  0xb0   :  { %v243_v16 = vmul.f32 %v315_v14, %v452_v3 }
  0xb1   :  { %260 = vst [vmem:[#allocation2 + $0x68] sm:$0xff] %v244_v15 }
  0xb2   :  { %v317_v19 = vpop.eup %316  ;;  %259 = vst [vmem:[#allocation2 + $0x60] sm:$0xff] %v243_v16 }
  0xb3   :  { %v319_v20 = vpop.eup %318  ;;  %v246_v21 = vmul.f32 %v317_v19, %v452_v3 }
  0xb4   :  { %v245_v22 = vmul.f32 %v319_v20, %v452_v3 }
  0xb5   :  { %262 = vst [vmem:[#allocation2 + $0x78] sm:$0xff] %v246_v21 }
  0xb6   :  { %261 = vst [vmem:[#allocation2 + $0x70] sm:$0xff] %v245_v22 }
  0xb7   :  { %331 = shalt.err (!%p328_p4)
}
  0xb8   :  { %s332_s28 = scalar_lea.hbm %s500_s4, 2048 }
  0xb9   :  { %p333_p5 = scmp.ne.s32.totalorder %s500_s4, %s332_s28  ;;  %p336_p6 = scmp.lt.u32.totalorder %s332_s28, %s500_s4 }
  0xbb   :  { %p338_p7 = pnand %p336_p6, %p333_p5 }
  0xbd   :  { %341 = shalt.err (!%p338_p7)
}
  0xbe   :  { %s346_s7 = smov 128   ;;  %s347_s8 = smov 8  }
  0xbf   :  { %274 = dma.vmem_to_hbm [thread:$0]  %s269_s3, 2048, %s500_s4, [#allocation3], %s346_s7, %s346_s7, %s347_s8  }
  0xc0   :  { %342 = dma.done.wait [#allocation3], 2048  }
  0xc1   :  { %343 = vsyncadd [#allocation3], 4294965248 }
  0xc2   :  { %278 = vsyncpa [#allocation3], 1 }

</bundles_post_ra>
